<compile_context>
chip_gen: v6e
topology: v6e:2x2x1
jax: 0.10.0
libtpu: 0.0.40
codegen_flags: <defaults>
</compile_context>

<pallas_src>
import numpy as np

import jax
import jax.numpy as jnp
from jax import lax
from jax.experimental import pallas as pl
from jax.experimental.pallas import tpu as pltpu

_NUM_CLASSES = 10          # dense2 output features (module spec)
_LANE = 128                # TPU vreg lane width


# ----------------------------- fused Pallas kernel -----------------------------

def mynet_kernel(p_ref, cw_ref, cb_ref, w1_ref, b1_ref, w2_ref, b2_ref, o_ref):
    """Conv(3x3,pad1) + ReLU + MaxPool(2) + Linear(288,128) + ReLU + Linear(128,10pad128).

    p_ref : (4, NP*B, Cin*9)  im2col patches; leading axis = pool-window corner
            (dh*2+dw); row index = s*B + b with s = ph*3 + pw.
    cw_ref: (Cin*9, 32)       conv weight, column order c*9 + kh*3 + kw.
    cb_ref: (1, 32)           conv bias.
    w1_ref: (NP, 32, 128)     dense1 weight, pre-permuted so block s multiplies the
                              pooled activations at spatial position s (folds the
                              PyTorch (C,H,W) flatten into the weight layout).
    b1_ref: (1, 128)          dense1 bias.
    w2_ref: (128, 128)        dense2 weight, zero-padded from 10 -> 128 columns so the
                              output store is lane-dense.
    b2_ref: (1, 128)          dense2 bias, zero-padded.
    o_ref : (B, 128)          padded logits; columns >= 10 are exactly zero.
    """
    B = o_ref.shape[0]
    NP = w1_ref.shape[0]          # number of pooled spatial positions (3*3 = 9)

    # conv (im2col matmul) + bias + ReLU, fused with the 2x2 max pool: the four
    # pool-window corners sit on p_ref's leading axis, so pooling is a pure
    # elementwise max on data already resident in vregs.
    pooled = None
    for corner in range(p_ref.shape[0]):
        c = jnp.dot(p_ref[corner], cw_ref[...], preferred_element_type=jnp.float32)
        c = jnp.maximum(c + cb_ref[...], 0.0)                       # (NP*B, 32)
        pooled = c if pooled is None else jnp.maximum(pooled, c)

    # dense1: the flatten is folded into per-spatial-position weight blocks, so the
    # first Linear is a sum of NP small (B,32)@(32,128) matmuls (no reshape/transpose).
    acc = jnp.dot(pooled[0:B, :], w1_ref[0], preferred_element_type=jnp.float32)
    for s in range(1, NP):
        acc = acc + jnp.dot(pooled[s * B:(s + 1) * B, :], w1_ref[s],
                            preferred_element_type=jnp.float32)
    h = jnp.maximum(acc + b1_ref[...], 0.0)                          # (B, 128)

    # dense2 (lane-padded -> single unmasked lane-dense store)
    o_ref[...] = (jnp.dot(h, w2_ref[...], preferred_element_type=jnp.float32)
                  + b2_ref[...])


# ----------------------------- host-side glue -----------------------------

def _build_patch_index(B, C, H, W, KH=3, KW=3):
    """Gather indices (into the flattened padded input) for the im2col patches.

    Output shape (4, (H//2)*(W//2)*B, C*KH*KW):
      axis 0: pool-window corner dh*2 + dw
      axis 1: row = (ph*(W//2) + pw)*B + b
      axis 2: column = c*KH*KW + kh*KW + kw   (matches Conv2d weight.reshape(Cout,-1))
    Built once on the host with numpy (zero runtime cost).
    """
    Hp, Wp = H + 2, W + 2
    PH, PW = H // 2, W // 2
    idx = np.empty((4, PH * PW * B, C * KH * KW), dtype=np.int32)
    for dh in range(2):
        for dw in range(2):
            corner = dh * 2 + dw
            for ph in range(PH):
                for pw in range(PW):
                    for b in range(B):
                        r = (ph * PW + pw) * B + b
                        for c in range(C):
                            for kh in range(KH):
                                for kw in range(KW):
                                    col = (c * KH + kh) * KW + kw
                                    hh = 2 * ph + dh + kh
                                    ww = 2 * pw + dw + kw
                                    idx[corner, r, col] = ((b * C + c) * Hp + hh) * Wp + ww
    return idx


def prepare_params(conv_w, conv_b, w1, b1, w2, b2, B, H, W):
    """One-time (outside jit) parameter re-layout for the fused kernel."""
    Cout, Cin = conv_w.shape[0], conv_w.shape[1]
    NP = (H // 2) * (W // 2)
    cw = conv_w.reshape(Cout, Cin * 9).T                        # (27, 32)
    cb = conv_b.reshape(1, Cout)                                # (1, 32)
    # w1 rows are indexed by f = c*NP + s (PyTorch CHW flatten); regroup into
    # (s, c, :) blocks so the kernel consumes pooled activations directly.
    w1r = w1.reshape(Cout, NP, w1.shape[1]).transpose(1, 0, 2)  # (9, 32, 128)
    b1r = b1.reshape(1, -1)
    # Lane-pad dense2 to 128 output columns (zeros) for an unmasked lane-dense store.
    pad = (-w2.shape[1]) % _LANE
    w2p = jnp.pad(w2, ((0, 0), (0, pad)))                       # (128, 128)
    b2p = jnp.pad(b2.reshape(1, -1), ((0, 0), (0, pad)))        # (1, 128)
    patch_idx = jnp.asarray(_build_patch_index(B, Cin, H, W))
    return patch_idx, cw, cb, w1r, b1r, w2p, b2p


@jax.jit
def mynet_forward(x, patch_idx, cw, cb, w1r, b1r, w2p, b2p):
    # Host-side im2col: pad once + single gather (constant index table).
    xp = jnp.pad(x, ((0, 0), (0, 0), (1, 1), (1, 1)))
    patches = xp.reshape(-1)[patch_idx]                         # (4, 9*B, 27)

    B = x.shape[0]
    vmem = pl.BlockSpec(memory_space=pltpu.MemorySpace.VMEM)    # whole-array VMEM blocks
    out_padded = pl.pallas_call(
        mynet_kernel,
        out_shape=jax.ShapeDtypeStruct((B, w2p.shape[1]), jnp.float32),
        in_specs=[vmem] * 7,
        out_specs=vmem,
    )(patches, cw, cb, w1r, b1r, w2p, b2p)
    return out_padded[:, :_NUM_CLASSES]


def _reference(x, conv_w, conv_b, w1, b1, w2, b2):
    """Pure-JAX reference matching PyTorch forward semantics."""
    c = lax.conv_general_dilated(
        x, conv_w, window_strides=(1, 1), padding=((1, 1), (1, 1)),
        dimension_numbers=("NCHW", "OIHW", "NCHW"))
    c = jnp.maximum(c + conv_b.reshape(1, -1, 1, 1), 0.0)
    p = lax.reduce_window(c, -jnp.inf, lax.max,
                          (1, 1, 2, 2), (1, 1, 2, 2), "VALID")
    flat = p.reshape(p.shape[0], -1)
    h = jnp.maximum(flat @ w1 + b1, 0.0)
    return h @ w2 + b2


if __name__ == "__main__":
    key = jax.random.PRNGKey(0)
    kx, k0, k1, k2, k3, k4, k5 = jax.random.split(key, 7)

    B, Cin, Hs, Ws, Cout = 2, 3, 6, 6, 32   # 6x6 spatial implied by Linear(32*3*3, 128)
    x = jax.random.normal(kx, (B, Cin, Hs, Ws), dtype=jnp.float32)

    # Deterministic synthetic parameters (shapes from MyNet.__init__).
    conv_w = jax.random.normal(k0, (Cout, Cin, 3, 3), dtype=jnp.float32) * 0.1
    conv_b = jax.random.normal(k1, (Cout,), dtype=jnp.float32) * 0.1
    w1 = jax.random.normal(k2, (Cout * 3 * 3, 128), dtype=jnp.float32) * 0.05
    b1 = jax.random.normal(k3, (128,), dtype=jnp.float32) * 0.05
    w2 = jax.random.normal(k4, (128, _NUM_CLASSES), dtype=jnp.float32) * 0.05
    b2 = jax.random.normal(k5, (_NUM_CLASSES,), dtype=jnp.float32) * 0.05

    params = prepare_params(conv_w, conv_b, w1, b1, w2, b2, B, Hs, Ws)
    out = mynet_forward(x, *params)
    out = jax.block_until_ready(out)
    assert out.shape == (B, _NUM_CLASSES) and out.dtype == jnp.float32

    ref = _reference(x, conv_w, conv_b, w1, b1, w2, b2)
    assert jnp.allclose(out, ref, atol=1e-4, rtol=1e-4), "mismatch vs reference"

    print("KERNEL_OK")
</pallas_src>

<mosaic_0001>
module attributes {stable_mosaic.version = 11 : i64} {
  func.func @mynet_kernel(%arg0: memref<4x18x27xf32, #tpu.memory_space<vmem>>, %arg1: memref<27x32xf32, #tpu.memory_space<vmem>>, %arg2: memref<1x32xf32, #tpu.memory_space<vmem>>, %arg3: memref<9x32x128xf32, #tpu.memory_space<vmem>>, %arg4: memref<1x128xf32, #tpu.memory_space<vmem>>, %arg5: memref<128x128xf32, #tpu.memory_space<vmem>>, %arg6: memref<1x128xf32, #tpu.memory_space<vmem>>, %arg7: memref<2x128xf32, #tpu.memory_space<vmem>>) attributes {dimension_semantics = [], scalar_prefetch = 0 : i64, scratch_operands = 0 : i64, tpu.core_type = #tpu.core_type<tc>} {
    %c0 = arith.constant 0 : index
    %c0_0 = arith.constant 0 : index
    %c0_1 = arith.constant 0 : index
    %0 = vector.load %arg0[%c0, %c0_0, %c0_1] : memref<4x18x27xf32, #tpu.memory_space<vmem>>, vector<1x18x27xf32>
    %1 = vector.shape_cast %0 : vector<1x18x27xf32> to vector<18x27xf32>
    %c0_2 = arith.constant 0 : index
    %c0_3 = arith.constant 0 : index
    %2 = vector.load %arg1[%c0_2, %c0_3] : memref<27x32xf32, #tpu.memory_space<vmem>>, vector<27x32xf32>
    %cst = arith.constant dense<0.000000e+00> : vector<18x32xf32>
    %3 = tpu.matmul %1, %2, %cst {dimension_numbers = #tpu.dot_dimension_numbers<[1], [0], [0], [1], [0, 0, 1, 1], [], []>} : vector<18x27xf32>, vector<27x32xf32>, vector<18x32xf32> -> vector<18x32xf32>
    %c0_4 = arith.constant 0 : index
    %c0_5 = arith.constant 0 : index
    %4 = vector.load %arg2[%c0_4, %c0_5] : memref<1x32xf32, #tpu.memory_space<vmem>>, vector<1x32xf32>
    %5 = vector.broadcast %4 : vector<1x32xf32> to vector<18x32xf32>
    %6 = arith.addf %3, %5 : vector<18x32xf32>
    %cst_6 = arith.constant 0.000000e+00 : f32
    %7 = vector.broadcast %cst_6 : f32 to vector<18x32xf32>
    %8 = arith.maximumf %6, %7 : vector<18x32xf32>
    %c1 = arith.constant 1 : index
    %c0_7 = arith.constant 0 : index
    %c0_8 = arith.constant 0 : index
    %9 = vector.load %arg0[%c1, %c0_7, %c0_8] : memref<4x18x27xf32, #tpu.memory_space<vmem>>, vector<1x18x27xf32>
    %10 = vector.shape_cast %9 : vector<1x18x27xf32> to vector<18x27xf32>
    %c0_9 = arith.constant 0 : index
    %c0_10 = arith.constant 0 : index
    %11 = vector.load %arg1[%c0_9, %c0_10] : memref<27x32xf32, #tpu.memory_space<vmem>>, vector<27x32xf32>
    %cst_11 = arith.constant dense<0.000000e+00> : vector<18x32xf32>
    %12 = tpu.matmul %10, %11, %cst_11 {dimension_numbers = #tpu.dot_dimension_numbers<[1], [0], [0], [1], [0, 0, 1, 1], [], []>} : vector<18x27xf32>, vector<27x32xf32>, vector<18x32xf32> -> vector<18x32xf32>
    %c0_12 = arith.constant 0 : index
    %c0_13 = arith.constant 0 : index
    %13 = vector.load %arg2[%c0_12, %c0_13] : memref<1x32xf32, #tpu.memory_space<vmem>>, vector<1x32xf32>
    %14 = vector.broadcast %13 : vector<1x32xf32> to vector<18x32xf32>
    %15 = arith.addf %12, %14 : vector<18x32xf32>
    %cst_14 = arith.constant 0.000000e+00 : f32
    %16 = vector.broadcast %cst_14 : f32 to vector<18x32xf32>
    %17 = arith.maximumf %15, %16 : vector<18x32xf32>
    %18 = arith.maximumf %8, %17 : vector<18x32xf32>
    %c2 = arith.constant 2 : index
    %c0_15 = arith.constant 0 : index
    %c0_16 = arith.constant 0 : index
    %19 = vector.load %arg0[%c2, %c0_15, %c0_16] : memref<4x18x27xf32, #tpu.memory_space<vmem>>, vector<1x18x27xf32>
    %20 = vector.shape_cast %19 : vector<1x18x27xf32> to vector<18x27xf32>
    %c0_17 = arith.constant 0 : index
    %c0_18 = arith.constant 0 : index
    %21 = vector.load %arg1[%c0_17, %c0_18] : memref<27x32xf32, #tpu.memory_space<vmem>>, vector<27x32xf32>
    %cst_19 = arith.constant dense<0.000000e+00> : vector<18x32xf32>
    %22 = tpu.matmul %20, %21, %cst_19 {dimension_numbers = #tpu.dot_dimension_numbers<[1], [0], [0], [1], [0, 0, 1, 1], [], []>} : vector<18x27xf32>, vector<27x32xf32>, vector<18x32xf32> -> vector<18x32xf32>
    %c0_20 = arith.constant 0 : index
    %c0_21 = arith.constant 0 : index
    %23 = vector.load %arg2[%c0_20, %c0_21] : memref<1x32xf32, #tpu.memory_space<vmem>>, vector<1x32xf32>
    %24 = vector.broadcast %23 : vector<1x32xf32> to vector<18x32xf32>
    %25 = arith.addf %22, %24 : vector<18x32xf32>
    %cst_22 = arith.constant 0.000000e+00 : f32
    %26 = vector.broadcast %cst_22 : f32 to vector<18x32xf32>
    %27 = arith.maximumf %25, %26 : vector<18x32xf32>
    %28 = arith.maximumf %18, %27 : vector<18x32xf32>
    %c3 = arith.constant 3 : index
    %c0_23 = arith.constant 0 : index
    %c0_24 = arith.constant 0 : index
    %29 = vector.load %arg0[%c3, %c0_23, %c0_24] : memref<4x18x27xf32, #tpu.memory_space<vmem>>, vector<1x18x27xf32>
    %30 = vector.shape_cast %29 : vector<1x18x27xf32> to vector<18x27xf32>
    %c0_25 = arith.constant 0 : index
    %c0_26 = arith.constant 0 : index
    %31 = vector.load %arg1[%c0_25, %c0_26] : memref<27x32xf32, #tpu.memory_space<vmem>>, vector<27x32xf32>
    %cst_27 = arith.constant dense<0.000000e+00> : vector<18x32xf32>
    %32 = tpu.matmul %30, %31, %cst_27 {dimension_numbers = #tpu.dot_dimension_numbers<[1], [0], [0], [1], [0, 0, 1, 1], [], []>} : vector<18x27xf32>, vector<27x32xf32>, vector<18x32xf32> -> vector<18x32xf32>
    %c0_28 = arith.constant 0 : index
    %c0_29 = arith.constant 0 : index
    %33 = vector.load %arg2[%c0_28, %c0_29] : memref<1x32xf32, #tpu.memory_space<vmem>>, vector<1x32xf32>
    %34 = vector.broadcast %33 : vector<1x32xf32> to vector<18x32xf32>
    %35 = arith.addf %32, %34 : vector<18x32xf32>
    %cst_30 = arith.constant 0.000000e+00 : f32
    %36 = vector.broadcast %cst_30 : f32 to vector<18x32xf32>
    %37 = arith.maximumf %35, %36 : vector<18x32xf32>
    %38 = arith.maximumf %28, %37 : vector<18x32xf32>
    %39 = vector.extract_strided_slice %38 {offsets = [0, 0], sizes = [2, 32], strides = [1, 1]} : vector<18x32xf32> to vector<2x32xf32>
    %c0_31 = arith.constant 0 : index
    %c0_32 = arith.constant 0 : index
    %c0_33 = arith.constant 0 : index
    %40 = vector.load %arg3[%c0_31, %c0_32, %c0_33] : memref<9x32x128xf32, #tpu.memory_space<vmem>>, vector<1x32x128xf32>
    %41 = vector.shape_cast %40 : vector<1x32x128xf32> to vector<32x128xf32>
    %cst_34 = arith.constant dense<0.000000e+00> : vector<2x128xf32>
    %42 = tpu.matmul %39, %41, %cst_34 {dimension_numbers = #tpu.dot_dimension_numbers<[1], [0], [0], [1], [0, 0, 1, 1], [], []>} : vector<2x32xf32>, vector<32x128xf32>, vector<2x128xf32> -> vector<2x128xf32>
    %43 = vector.extract_strided_slice %38 {offsets = [2, 0], sizes = [2, 32], strides = [1, 1]} : vector<18x32xf32> to vector<2x32xf32>
    %c1_35 = arith.constant 1 : index
    %c0_36 = arith.constant 0 : index
    %c0_37 = arith.constant 0 : index
    %44 = vector.load %arg3[%c1_35, %c0_36, %c0_37] : memref<9x32x128xf32, #tpu.memory_space<vmem>>, vector<1x32x128xf32>
    %45 = vector.shape_cast %44 : vector<1x32x128xf32> to vector<32x128xf32>
    %cst_38 = arith.constant dense<0.000000e+00> : vector<2x128xf32>
    %46 = tpu.matmul %43, %45, %cst_38 {dimension_numbers = #tpu.dot_dimension_numbers<[1], [0], [0], [1], [0, 0, 1, 1], [], []>} : vector<2x32xf32>, vector<32x128xf32>, vector<2x128xf32> -> vector<2x128xf32>
    %47 = arith.addf %42, %46 : vector<2x128xf32>
    %48 = vector.extract_strided_slice %38 {offsets = [4, 0], sizes = [2, 32], strides = [1, 1]} : vector<18x32xf32> to vector<2x32xf32>
    %c2_39 = arith.constant 2 : index
    %c0_40 = arith.constant 0 : index
    %c0_41 = arith.constant 0 : index
    %49 = vector.load %arg3[%c2_39, %c0_40, %c0_41] : memref<9x32x128xf32, #tpu.memory_space<vmem>>, vector<1x32x128xf32>
    %50 = vector.shape_cast %49 : vector<1x32x128xf32> to vector<32x128xf32>
    %cst_42 = arith.constant dense<0.000000e+00> : vector<2x128xf32>
    %51 = tpu.matmul %48, %50, %cst_42 {dimension_numbers = #tpu.dot_dimension_numbers<[1], [0], [0], [1], [0, 0, 1, 1], [], []>} : vector<2x32xf32>, vector<32x128xf32>, vector<2x128xf32> -> vector<2x128xf32>
    %52 = arith.addf %47, %51 : vector<2x128xf32>
    %53 = vector.extract_strided_slice %38 {offsets = [6, 0], sizes = [2, 32], strides = [1, 1]} : vector<18x32xf32> to vector<2x32xf32>
    %c3_43 = arith.constant 3 : index
    %c0_44 = arith.constant 0 : index
    %c0_45 = arith.constant 0 : index
    %54 = vector.load %arg3[%c3_43, %c0_44, %c0_45] : memref<9x32x128xf32, #tpu.memory_space<vmem>>, vector<1x32x128xf32>
    %55 = vector.shape_cast %54 : vector<1x32x128xf32> to vector<32x128xf32>
    %cst_46 = arith.constant dense<0.000000e+00> : vector<2x128xf32>
    %56 = tpu.matmul %53, %55, %cst_46 {dimension_numbers = #tpu.dot_dimension_numbers<[1], [0], [0], [1], [0, 0, 1, 1], [], []>} : vector<2x32xf32>, vector<32x128xf32>, vector<2x128xf32> -> vector<2x128xf32>
    %57 = arith.addf %52, %56 : vector<2x128xf32>
    %58 = vector.extract_strided_slice %38 {offsets = [8, 0], sizes = [2, 32], strides = [1, 1]} : vector<18x32xf32> to vector<2x32xf32>
    %c4 = arith.constant 4 : index
    %c0_47 = arith.constant 0 : index
    %c0_48 = arith.constant 0 : index
    %59 = vector.load %arg3[%c4, %c0_47, %c0_48] : memref<9x32x128xf32, #tpu.memory_space<vmem>>, vector<1x32x128xf32>
    %60 = vector.shape_cast %59 : vector<1x32x128xf32> to vector<32x128xf32>
    %cst_49 = arith.constant dense<0.000000e+00> : vector<2x128xf32>
    %61 = tpu.matmul %58, %60, %cst_49 {dimension_numbers = #tpu.dot_dimension_numbers<[1], [0], [0], [1], [0, 0, 1, 1], [], []>} : vector<2x32xf32>, vector<32x128xf32>, vector<2x128xf32> -> vector<2x128xf32>
    %62 = arith.addf %57, %61 : vector<2x128xf32>
    %63 = vector.extract_strided_slice %38 {offsets = [10, 0], sizes = [2, 32], strides = [1, 1]} : vector<18x32xf32> to vector<2x32xf32>
    %c5 = arith.constant 5 : index
    %c0_50 = arith.constant 0 : index
    %c0_51 = arith.constant 0 : index
    %64 = vector.load %arg3[%c5, %c0_50, %c0_51] : memref<9x32x128xf32, #tpu.memory_space<vmem>>, vector<1x32x128xf32>
    %65 = vector.shape_cast %64 : vector<1x32x128xf32> to vector<32x128xf32>
    %cst_52 = arith.constant dense<0.000000e+00> : vector<2x128xf32>
    %66 = tpu.matmul %63, %65, %cst_52 {dimension_numbers = #tpu.dot_dimension_numbers<[1], [0], [0], [1], [0, 0, 1, 1], [], []>} : vector<2x32xf32>, vector<32x128xf32>, vector<2x128xf32> -> vector<2x128xf32>
    %67 = arith.addf %62, %66 : vector<2x128xf32>
    %68 = vector.extract_strided_slice %38 {offsets = [12, 0], sizes = [2, 32], strides = [1, 1]} : vector<18x32xf32> to vector<2x32xf32>
    %c6 = arith.constant 6 : index
    %c0_53 = arith.constant 0 : index
    %c0_54 = arith.constant 0 : index
    %69 = vector.load %arg3[%c6, %c0_53, %c0_54] : memref<9x32x128xf32, #tpu.memory_space<vmem>>, vector<1x32x128xf32>
    %70 = vector.shape_cast %69 : vector<1x32x128xf32> to vector<32x128xf32>
    %cst_55 = arith.constant dense<0.000000e+00> : vector<2x128xf32>
    %71 = tpu.matmul %68, %70, %cst_55 {dimension_numbers = #tpu.dot_dimension_numbers<[1], [0], [0], [1], [0, 0, 1, 1], [], []>} : vector<2x32xf32>, vector<32x128xf32>, vector<2x128xf32> -> vector<2x128xf32>
    %72 = arith.addf %67, %71 : vector<2x128xf32>
    %73 = vector.extract_strided_slice %38 {offsets = [14, 0], sizes = [2, 32], strides = [1, 1]} : vector<18x32xf32> to vector<2x32xf32>
    %c7 = arith.constant 7 : index
    %c0_56 = arith.constant 0 : index
    %c0_57 = arith.constant 0 : index
    %74 = vector.load %arg3[%c7, %c0_56, %c0_57] : memref<9x32x128xf32, #tpu.memory_space<vmem>>, vector<1x32x128xf32>
    %75 = vector.shape_cast %74 : vector<1x32x128xf32> to vector<32x128xf32>
    %cst_58 = arith.constant dense<0.000000e+00> : vector<2x128xf32>
    %76 = tpu.matmul %73, %75, %cst_58 {dimension_numbers = #tpu.dot_dimension_numbers<[1], [0], [0], [1], [0, 0, 1, 1], [], []>} : vector<2x32xf32>, vector<32x128xf32>, vector<2x128xf32> -> vector<2x128xf32>
    %77 = arith.addf %72, %76 : vector<2x128xf32>
    %78 = vector.extract_strided_slice %38 {offsets = [16, 0], sizes = [2, 32], strides = [1, 1]} : vector<18x32xf32> to vector<2x32xf32>
    %c8 = arith.constant 8 : index
    %c0_59 = arith.constant 0 : index
    %c0_60 = arith.constant 0 : index
    %79 = vector.load %arg3[%c8, %c0_59, %c0_60] : memref<9x32x128xf32, #tpu.memory_space<vmem>>, vector<1x32x128xf32>
    %80 = vector.shape_cast %79 : vector<1x32x128xf32> to vector<32x128xf32>
    %cst_61 = arith.constant dense<0.000000e+00> : vector<2x128xf32>
    %81 = tpu.matmul %78, %80, %cst_61 {dimension_numbers = #tpu.dot_dimension_numbers<[1], [0], [0], [1], [0, 0, 1, 1], [], []>} : vector<2x32xf32>, vector<32x128xf32>, vector<2x128xf32> -> vector<2x128xf32>
    %82 = arith.addf %77, %81 : vector<2x128xf32>
    %c0_62 = arith.constant 0 : index
    %c0_63 = arith.constant 0 : index
    %83 = vector.load %arg4[%c0_62, %c0_63] : memref<1x128xf32, #tpu.memory_space<vmem>>, vector<1x128xf32>
    %84 = vector.broadcast %83 : vector<1x128xf32> to vector<2x128xf32>
    %85 = arith.addf %82, %84 : vector<2x128xf32>
    %cst_64 = arith.constant 0.000000e+00 : f32
    %86 = vector.broadcast %cst_64 : f32 to vector<2x128xf32>
    %87 = arith.maximumf %85, %86 : vector<2x128xf32>
    %c0_65 = arith.constant 0 : index
    %c0_66 = arith.constant 0 : index
    %88 = vector.load %arg5[%c0_65, %c0_66] : memref<128x128xf32, #tpu.memory_space<vmem>>, vector<128x128xf32>
    %cst_67 = arith.constant dense<0.000000e+00> : vector<2x128xf32>
    %89 = tpu.matmul %87, %88, %cst_67 {dimension_numbers = #tpu.dot_dimension_numbers<[1], [0], [0], [1], [0, 0, 1, 1], [], []>} : vector<2x128xf32>, vector<128x128xf32>, vector<2x128xf32> -> vector<2x128xf32>
    %c0_68 = arith.constant 0 : index
    %c0_69 = arith.constant 0 : index
    %90 = vector.load %arg6[%c0_68, %c0_69] : memref<1x128xf32, #tpu.memory_space<vmem>>, vector<1x128xf32>
    %91 = vector.broadcast %90 : vector<1x128xf32> to vector<2x128xf32>
    %92 = arith.addf %89, %91 : vector<2x128xf32>
    %c0_70 = arith.constant 0 : index
    %c0_71 = arith.constant 0 : index
    %93 = vector.load %arg7[%c0_70, %c0_71] : memref<2x128xf32, #tpu.memory_space<vmem>>, vector<2x128xf32>
    tpu.vector_store %arg7[%c0_70, %c0_71], %92 {strides = array<i32>} : memref<2x128xf32, #tpu.memory_space<vmem>>, vector<2x128xf32>,
    return
  }
}

</mosaic_0001>

<bundles_post_ra>
// kernel: mynet_forward.1
= control target key start
LH: loop header
LB: loop body
LE: loop exit
PB: predicated region body
PF: predicated region fallthrough
CT: control target
= control target key end

     0   :  { %vm51_vm0 = vcmask 1042432   ;;  %v1647_v1 = vmov 0.0   ;;  %vm1648_vm1 = vmmov 0   ;;  %s2069_s0 = inlined_call_operand.vmem [shape: f32[4,18,27], index: 0, kind: input, shape index: {}]   ;;  %s2070_s1 = inlined_call_operand.vmem [shape: f32[27,32], index: 1, kind: input, shape index: {}]   ;;  %s2071_s2 = inlined_call_operand.vmem [shape: f32[1,32], index: 2, kind: input, shape index: {}]   ;;  %s2072_s3 = inlined_call_operand.vmem [shape: f32[9,32,128], index: 3, kind: input, shape index: {}]   ;;  %s2073_s4 = inlined_call_operand.vmem [shape: f32[1,128], index: 4, kind: input, shape index: {}]   ;;  %s2074_s5 = inlined_call_operand.vmem [shape: f32[128,128], index: 5, kind: input, shape index: {}]   ;;  %s2075_s6 = inlined_call_operand.vmem [shape: f32[1,128], index: 6, kind: input, shape index: {}]   ;;  %s2076_s7 = inlined_call_operand.hbm [shape: f32[2,128], index: 7, kind: output, shape index: {}]  }
   0x1   :  { %v33_v0 = vld [vmem:[%s2070_s1 + $0x18] sm:$0x7]  ;;  %1420 = vmatprep.subr.mxu0 %v1647_v1  ;;  %v32_v2 = vld [vmem:[%s2070_s1 + $0x10] sm:$0xff]  ;;  %1471 = vmatprep.subr.mxu1 %v1647_v1  ;;  %v31_v3 = vld [vmem:[%s2070_s1 + $0x8] sm:$0xff] }
   0x2   :  { %1421 = vmatpush3.msk.msra.mxu0 %vm51_vm0, %v33_v0  ;;  %1428 = vmatprep.mubr.msk.f32.mxu0 %vm1648_vm1, %v1647_v1  ;;  %v30_v4 = vld [vmem:[%s2070_s1] sm:$0xff] }
   0x3   :  { %1422 = vmatprep.subr.mxu0 %v1647_v1  ;;  %1472 = vmatpush3.msk.msra.mxu1 %vm51_vm0, %v33_v0 }
   0x4   :  { %1423 = vmatpush3.msra.mxu0 %v32_v2  ;;  %1473 = vmatprep.subr.mxu1 %v1647_v1 }
   0x5   :  { %1424 = vmatprep.subr.mxu0 %v1647_v1  ;;  %1474 = vmatpush3.msra.mxu1 %v32_v2 }
   0x6   :  { %12 = vsyncpa [#allocation3], 0  ;;  %1425 = vmatpush3.msra.mxu0 %v31_v3  ;;  %v27_v5 = vld [vmem:[%s2069_s0] sm:$0xff]  ;;  %vm41_vm2 = vcmask 220160   ;;  %1475 = vmatprep.subr.mxu1 %v1647_v1  ;;  %v28_v6 = vld [vmem:[%s2069_s0 + $0x8] sm:$0xff]  ;;  %vm446_vm3 = vcmask 261120  }
   0x7   :  { %1426 = vmatprep.subr.mxu0 %v1647_v1  ;;  %1476 = vmatpush3.msra.mxu1 %v31_v3  ;;  %v1280_v7 = vld [vmem:[%s2069_s0 + $0x48] sm:$0xff]  ;;  %v29_v8 = vld [vmem:[%s2069_s0 + $0x10] sm:$0x3]  ;;  %v1266_v10 = vld [vmem:[%s2069_s0 + $0x18] sm:$0xff]  ;;  %s1649_s11 = smov [#allocation2]  }
   0x8   :  { %1427 = vmatpush3.msra.mxu0 %v30_v4  ;;  %1477 = vmatprep.subr.mxu1 %v1647_v1  ;;  %v1281_v9 = vld [vmem:[%s2069_s0 + $0x50] sm:$0xff]  ;;  %v1282_v11 = vld [vmem:[%s2069_s0 + $0x58] sm:$0x3]  ;;  %v1267_v12 = vld [vmem:[%s2069_s0 + $0x20] sm:$0xff]  ;;  %s1253_s12 = sshll.u32 %s1649_s11, 4  ;;  %s1254_s12 = int_to_ptr.vmem [resolvable:$true] %s1253_s12 }
   0x9   :  { %1429 = vmatmul.mubr.msk.f32.vlgmr.msra.gmra.mxu0 %vm41_vm2, %v27_v5  ;;  %1437 = vmatprep.subr.mxu0 %v1647_v1  ;;  %v1268_v13 = vld [vmem:[%s2069_s0 + $0x28] sm:$0x3]  ;;  %v1273_v14 = vld [vmem:[%s2069_s0 + $0x30] sm:$0xff]  ;;  %v1274_v15 = vld [vmem:[%s2069_s0 + $0x38] sm:$0xff]  ;;  %s1625_s13 = scalar_lea.vmem %s1254_s12, 32  ;;  %p1630_p1 = scmp.lt.s32.totalorder %s1254_s12, %s1254_s12 }
   0xa   :  { %1438 = vmatpush3.msk.msra.mxu0 %vm51_vm0, %v33_v0  ;;  %1431 = vmatprep.mubr.msk.f32.mxu0 %vm1648_vm1, %v1647_v1  ;;  %v1275_v16 = vld [vmem:[%s2069_s0 + $0x40] sm:$0x3]  ;;  %v438_v17 = vld [vmem:[%s2072_s3 + $0x18] sm:$0xff]  ;;  %v437_v19 = vld [vmem:[%s2072_s3 + $0x10] sm:$0xff]  ;;  %p1626_p0 = scmp.ne.s32.totalorder %s1254_s12, %s1625_s13  ;;  %p1631_p2 = scmp.lt.s32.totalorder %s1625_s13, %s1625_s13 }
   0xb   :  { %1439 = vmatprep.subr.mxu0 %v1647_v1  ;;  %1478 = vmatpush3.msra.mxu1 %v30_v4  ;;  %v1290_v18 = vld [vmem:[%s2072_s3 + $0x38] sm:$0xff]  ;;  %v1289_v20 = vld [vmem:[%s2072_s3 + $0x30] sm:$0xff]  ;;  %v436_v21 = vld [vmem:[%s2072_s3 + $0x8] sm:$0xff] }
   0xc   :  { %1440 = vmatpush3.msra.mxu0 %v32_v2  ;;  %1479 = vmatprep.mubr.msk.f32.mxu1 %vm1648_vm1, %v1647_v1  ;;  %v1288_v22 = vld [vmem:[%s2072_s3 + $0x28] sm:$0xff]  ;;  %v435_v23 = vld [vmem:[%s2072_s3] sm:$0xff]  ;;  %v1301_v60 = vld [vmem:[%s2072_s3 + $0x78] sm:$0xff]  ;;  %p1632_p3 = por %p1631_p2, %p1630_p1 }
   0xd   :  { %1432 = vmatmul.mubr.msk.f32.gmra.mxu0 %vm41_vm2, %v28_v6  ;;  %1441 = vmatprep.subr.mxu0 %v1647_v1  ;;  %v1287_v24 = vld [vmem:[%s2072_s3 + $0x20] sm:$0xff]  ;;  %v1295_v6 = vld [vmem:[%s2072_s3 + $0x50] sm:$0xff] }
   0xe   :  { %1434 = vmatprep.mubr.msk.f32.mxu0 %vm1648_vm1, %v1647_v1  ;;  %1442 = vmatpush3.msra.mxu0 %v31_v3  ;;  %v1839_v40 = vld [vmem:[%s2071_s2] ss:$0 sm:$0xff]  ;;  %p1633_p4 = pnand %p1632_p3, %p1626_p0 }
   0xf   :  { %1443 = vmatprep.subr.mxu0 %v1647_v1  ;;  %1480 = vmatmul.mubr.msk.f32.vlgmr.msra.gmra.mxu1 %vm41_vm2, %v1280_v7  ;;  %v1299_v7 = vld [vmem:[%s2072_s3 + $0x68] sm:$0xff] }
  0x10   :  { %1444 = vmatpush3.msra.mxu0 %v30_v4  ;;  %1482 = vmatprep.mubr.msk.f32.mxu1 %vm1648_vm1, %v1647_v1 }
  0x11   :  { %1435 = vmatmul.mubr.msk.f32.gmra.mxu0 %vm41_vm2, %v29_v8  ;;  %1454 = vmatprep.subr.mxu0 %v1647_v1 }
  0x12   :  { %1445 = vmatprep.mubr.msk.f32.mxu0 %vm1648_vm1, %v1647_v1  ;;  %1499 = vmatprep.subr.mxu1 %v1647_v1 }
  0x13   :  { %1483 = vmatmul.mubr.msk.f32.gmra.mxu1 %vm41_vm2, %v1281_v9 }
  0x14   :  { %1485 = vmatprep.mubr.msk.f32.mxu1 %vm1648_vm1, %v1647_v1  ;;  %1500 = vmatpush3.msra.mxu1 %v438_v17 }
  0x15   :  { %1446 = vmatmul.mubr.msk.f32.vlgmr.msra.gmra.mxu0 %vm41_vm2, %v1266_v10  ;;  %1501 = vmatprep.subr.mxu1 %v1647_v1 }
  0x16   :  { %1455 = vmatpush3.msk.msra.mxu0 %vm51_vm0, %v33_v0  ;;  %1448 = vmatprep.mubr.msk.f32.mxu0 %vm1648_vm1, %v1647_v1 }
  0x17   :  { %1456 = vmatprep.subr.mxu0 %v1647_v1  ;;  %1486 = vmatmul.mubr.msk.f32.gmra.mxu1 %vm41_vm2, %v1282_v11  ;;  %v1294_v11 = vld [vmem:[%s2072_s3 + $0x48] sm:$0xff] }
  0x18   :  { %1457 = vmatpush3.msra.mxu0 %v32_v2  ;;  %1507 = vmatprep.mubr.msk.f32.mxu1 %vm1648_vm1, %v1647_v1  ;;  %v1296_v2 = vld [vmem:[%s2072_s3 + $0x58] sm:$0xff] }
  0x19   :  { %1449 = vmatmul.mubr.msk.f32.gmra.mxu0 %vm41_vm2, %v1267_v12  ;;  %1458 = vmatprep.subr.mxu0 %v1647_v1  ;;  %v1298_v12 = vld [vmem:[%s2072_s3 + $0x60] sm:$0xff] }
  0x1a   :  { %1451 = vmatprep.mubr.msk.f32.mxu0 %vm1648_vm1, %v1647_v1  ;;  %1459 = vmatpush3.msra.mxu0 %v31_v3  ;;  %v1300_v3 = vld [vmem:[%s2072_s3 + $0x70] sm:$0xff] }
  0x1b   :  { %1460 = vmatprep.subr.mxu0 %v1647_v1  ;;  %1502 = vmatpush3.msra.mxu1 %v437_v19 }
  0x1c   :  { %1461 = vmatpush3.msra.mxu0 %v30_v4  ;;  %1503 = vmatprep.subr.mxu1 %v1647_v1 }
  0x1d   :  { %1452 = vmatmul.mubr.msk.f32.gmra.mxu0 %vm41_vm2, %v1268_v13  ;;  %1488 = vmatprep.subr.mxu0 %v1647_v1 }
  0x1e   :  { %1462 = vmatprep.mubr.msk.f32.mxu0 %vm1648_vm1, %v1647_v1  ;;  %1504 = vmatpush3.msra.mxu1 %v436_v21  ;;  %v1310_v21 = vld [vmem:[%s2072_s3 + $0xb0] sm:$0xff] }
  0x1f   :  { %1505 = vmatprep.subr.mxu1 %v1647_v1 }
  0x20   :  { %1506 = vmatpush3.msra.mxu1 %v435_v23 }
  0x21   :  { %1463 = vmatmul.mubr.msk.f32.vlgmr.msra.gmra.mxu0 %vm41_vm2, %v1273_v14  ;;  %1521 = vmatprep.subr.mxu1 %v1647_v1 }
  0x22   :  { %1465 = vmatprep.mubr.msk.f32.mxu0 %vm1648_vm1, %v1647_v1  ;;  %1489 = vmatpush3.msra.mxu0 %v1290_v18 }
  0x23   :  { %1490 = vmatprep.subr.mxu0 %v1647_v1 }
  0x24   :  { %1491 = vmatpush3.msra.mxu0 %v1289_v20  ;;  %v1306_v20 = vld [vmem:[%s2072_s3 + $0x98] sm:$0xff] }
  0x25   :  { %1466 = vmatmul.mubr.msk.f32.gmra.mxu0 %vm41_vm2, %v1274_v15  ;;  %1492 = vmatprep.subr.mxu0 %v1647_v1  ;;  %v1293_v15 = vld [vmem:[%s2072_s3 + $0x40] sm:$0xff] }
  0x26   :  { %1468 = vmatprep.mubr.msk.f32.mxu0 %vm1648_vm1, %v1647_v1  ;;  %1493 = vmatpush3.msra.mxu0 %v1288_v22  ;;  %v1305_v22 = vld [vmem:[%s2072_s3 + $0x90] sm:$0xff] }
  0x27   :  { %1494 = vmatprep.subr.mxu0 %v1647_v1 }
  0x28   :  { %1495 = vmatpush3.msra.mxu0 %v1287_v24  ;;  %v1309_v24 = vld [vmem:[%s2072_s3 + $0xa8] sm:$0xff] }
  0x29   :  { %1469 = vmatmul.mubr.msk.f32.gmra.mxu0 %vm41_vm2, %v1275_v16  ;;  %1510 = vmatprep.subr.mxu0 %v1647_v1  ;;  %v1311_v16 = vld [vmem:[%s2072_s3 + $0xb8] sm:$0xff] }
  0x2a   :  { %1496 = vmatprep.mubr.msk.f32.mxu0 %vm1648_vm1, %v1647_v1 }
  0xc9   :  { %v121_v25 = vpop.f32.mrf.mxu0 }
  0xca   :  { %v122_v44 = vadd.f32 %v1839_v40, %v121_v25  ;;  %v1304_v25 = vld [vmem:[%s2072_s3 + $0x88] sm:$0xff] }
  0xcb   :  { %v1430_v26 = vpop.f32.mrf.mxu0 }
  0xcc   :  { %v135_v49 = vmax.f32 %v122_v44, 0.0  ;;  %v1308_v26 = vld [vmem:[%s2072_s3 + $0xa0] sm:$0xff] }
  0xcd   :  { %v126_v27 = vpop.f32.mrf.mxu0 }
  0xce   :  { %v127_v62 = vadd.f32 %v1839_v40, %v126_v27 }
  0xcf   :  { %v1433_v28 = vpop.f32.mrf.mxu0  ;;  %v415_v29 = vpop.f32.mrf.mxu1 }
  0xd0   :  { %v416_v47 = vadd.f32 %v1839_v40, %v415_v29  ;;  %v136_v8 = vmax.f32 %v127_v62, 0.0  ;;  %v1303_v28 = vld [vmem:[%s2072_s3 + $0x80] sm:$0xff]  ;;  %v1321_v29 = vld [vmem:[%s2072_s3 + $0xf8] sm:$0xff] }
  0xd1   :  { %v1832_v30 = vpop.f32.mrf.mxu0  ;;  %v1481_v31 = vpop.f32.mrf.mxu1  ;;  %v1160_v62 = vld [vmem:[%s2074_s5 + $0x38] sm:$0xff] }
  0xd2   :  { %v429_v54 = vmax.f32 %v416_v47, 0.0  ;;  %v1316_v31 = vld [vmem:[%s2072_s3 + $0xd8] sm:$0xff] }
  0xd3   :  { %v1436_v32 = vpop.f32.mrf.mxu0  ;;  %v420_v33 = vpop.f32.mrf.mxu1 }
  0xd4   :  { %v421_v10 = vadd.f32 %v1839_v40, %v420_v33  ;;  %v1320_v32 = vld [vmem:[%s2072_s3 + $0xf0] sm:$0xff] }
  0xd5   :  { %v217_v34 = vpop.f32.mrf.mxu0  ;;  %v1484_v35 = vpop.f32.mrf.mxu1  ;;  %v1315_v33 = vld [vmem:[%s2072_s3 + $0xd0] sm:$0xff] }
  0xd6   :  { %v218_v42 = vadd.f32 %v1839_v40, %v217_v34  ;;  %v430_v18 = vmax.f32 %v421_v10, 0.0  ;;  %v1319_v35 = vld [vmem:[%s2072_s3 + $0xe8] sm:$0xff] }
  0xd7   :  { %v1447_v36 = vpop.f32.mrf.mxu0  ;;  %v1834_v37 = vpop.f32.mrf.mxu1 }
  0xd8   :  { %v231_v46 = vmax.f32 %v218_v42, 0.0  ;;  %v1314_v36 = vld [vmem:[%s2072_s3 + $0xc8] sm:$0xff]  ;;  %v426_v47 = vadd.f32 %v1839_v40, %v1834_v37  ;;  %v1325_v37 = vld [vmem:[%s2072_s3 + $0x110] sm:$0xff] }
  0xd9   :  { %v222_v38 = vpop.f32.mrf.mxu0  ;;  %v1487_v39 = vpop.f32.mrf.mxu1 }
  0xda   :  { %v234_v52 = vmax.f32 %v135_v49, %v231_v46  ;;  %v223_v58 = vadd.f32 %v1839_v40, %v222_v38  ;;  %v132_v38 = vadd.f32 %v1839_v40, %v1832_v30  ;;  %v1313_v30 = vld [vmem:[%s2072_s3 + $0xc0] sm:$0xff] }
  0xdb   :  { %v1450_v41 = vpop.f32.mrf.mxu0 }
  0xdc   :  { %v232_v5 = vmax.f32 %v223_v58, 0.0  ;;  %v1318_v41 = vld [vmem:[%s2072_s3 + $0xe0] sm:$0xff]  ;;  %v137_v44 = vmax.f32 %v132_v38, 0.0  ;;  %v1164_v58 = vld [vmem:[%s2074_s5 + $0x58] sm:$0xff] }
  0xdd   :  { %v1842_v43 = vpop.f32.mrf.mxu0 }
  0xde   :  { %v235_v13 = vmax.f32 %v136_v8, %v232_v5  ;;  %v228_v34 = vadd.f32 %v1839_v40, %v1842_v43  ;;  %v1154_v5 = vld [vmem:[%s2074_s5 + $0x8] sm:$0xff] }
  0xdf   :  { %v1453_v45 = vpop.f32.mrf.mxu0 }
  0xe0   :  { %v233_v42 = vmax.f32 %v228_v34, 0.0 }
  0xe1   :  { %v316_v48 = vpop.f32.mrf.mxu0 }
  0xe2   :  { %v317_v50 = vadd.f32 %v1839_v40, %v316_v48  ;;  %v1326_v48 = vld [vmem:[%s2072_s3 + $0x118] sm:$0xff]  ;;  %v236_v49 = vmax.f32 %v137_v44, %v233_v42 }
  0xe3   :  { %v1464_v51 = vpop.f32.mrf.mxu0 }
  0xe4   :  { %v330_v53 = vmax.f32 %v317_v50, 0.0  ;;  %v431_v50 = vmax.f32 %v426_v47, 0.0  ;;  %v1324_v51 = vld [vmem:[%s2072_s3 + $0x108] sm:$0xff] }
  0xe5   :  { %v321_v55 = vpop.f32.mrf.mxu0 }
  0xe6   :  { %v333_v56 = vmax.f32 %v234_v52, %v330_v53  ;;  %v322_v0 = vadd.f32 %v1839_v40, %v321_v55  ;;  %v1323_v52 = vld [vmem:[%s2072_s3 + $0x100] sm:$0xff]  ;;  %v1167_v55 = vld [vmem:[%s2074_s5 + $0x70] sm:$0xff] }
  0xe7   :  { %v1467_v57 = vpop.f32.mrf.mxu0 }
  0xe8   :  { %v432_v59 = vmax.f32 %v333_v56, %v429_v54  ;;  %v331_v9 = vmax.f32 %v322_v0, 0.0  ;;  %v1168_v54 = vld [vmem:[%s2074_s5 + $0x78] sm:$0xff]  ;;  %v1166_v56 = vld [vmem:[%s2074_s5 + $0x68] sm:$0xff]  ;;  %v1165_v57 = vld [vmem:[%s2074_s5 + $0x60] sm:$0xff] }
  0xe9   :  { %v1851_v61 = vpop.f32.mrf.mxu0  ;;  %v1158_v0 = vld [vmem:[%s2074_s5 + $0x28] sm:$0xff] }
  0xea   :  { %v445_v63 = vrot.slane %v432_v59, 2  ;;  %1508 = vmatmul.mubr.msk.f32.vlgmr.msra.gmra.mxu1 %vm446_vm3, %v432_v59  ;;  %v675_v14 = vrot.slane %v432_v59, 6  ;;  %v334_v17 = vmax.f32 %v235_v13, %v331_v9  ;;  %v596_v19 = vrot.slane %v432_v59, 4  ;;  %v1163_v59 = vld [vmem:[%s2074_s5 + $0x50] sm:$0xff] }
  0xeb   :  { %1522 = vmatpush3.msra.mxu1 %v1301_v60  ;;  %1529 = vmatprep.mubr.msk.f32.mxu1 %vm1648_vm1, %v1647_v1  ;;  %v1470_v4 = vpop.f32.mrf.mxu0  ;;  %v327_v39 = vadd.f32 %v1839_v40, %v1851_v61  ;;  %v1162_v60 = vld [vmem:[%s2074_s5 + $0x48] sm:$0xff]  ;;  %v1161_v61 = vld [vmem:[%s2074_s5 + $0x40] sm:$0xff] }
  0xec   :  { %1523 = vmatprep.subr.mxu1 %v1647_v1  ;;  %1497 = vmatmul.mubr.msk.f32.vlgmr.msra.gmra.mxu0 %vm446_vm3, %v445_v63  ;;  %v433_v23 = vmax.f32 %v334_v17, %v430_v18  ;;  %v1159_v63 = vld [vmem:[%s2074_s5 + $0x30] sm:$0xff] }
  0xed   :  { %1511 = vmatpush3.msra.mxu0 %v1296_v2  ;;  %1524 = vmatpush3.msra.mxu1 %v1300_v3  ;;  %v332_v46 = vmax.f32 %v327_v39, 0.0  ;;  %v1157_v2 = vld [vmem:[%s2074_s5 + $0x20] sm:$0xff]  ;;  %v1156_v3 = vld [vmem:[%s2074_s5 + $0x18] sm:$0xff]  ;;  %v1155_v4 = vld [vmem:[%s2074_s5 + $0x10] sm:$0xff] }
  0xee   :  { %1512 = vmatprep.subr.mxu0 %v1647_v1  ;;  %1525 = vmatprep.subr.mxu1 %v1647_v1  ;;  %v833_v27 = vrot.slane %v433_v23, 2  ;;  %v991_v43 = vrot.slane %v433_v23, 6  ;;  %v912_v45 = vrot.slane %v433_v23, 4 }
  0xef   :  { %1513 = vmatpush3.msra.mxu0 %v1295_v6  ;;  %1526 = vmatpush3.msra.mxu1 %v1299_v7  ;;  %v335_v40 = vmax.f32 %v236_v49, %v332_v46  ;;  %v1153_v6 = vld [vmem:[%s2074_s5] sm:$0xff] }
  0xf0   :  { %1514 = vmatprep.subr.mxu0 %v1647_v1  ;;  %1527 = vmatprep.subr.mxu1 %v1647_v1 }
  0xf1   :  { %1515 = vmatpush3.msra.mxu0 %v1294_v11  ;;  %1528 = vmatpush3.msra.mxu1 %v1298_v12  ;;  %v434_v53 = vmax.f32 %v335_v40, %v431_v50 }
  0xf2   :  { %1516 = vmatprep.subr.mxu0 %v1647_v1  ;;  %1530 = vmatmul.mubr.msk.f32.vlgmr.msra.gmra.mxu1 %vm446_vm3, %v675_v14 }
  0xf3   :  { %1543 = vmatprep.subr.mxu1 %v1647_v1  ;;  %1517 = vmatpush3.msra.mxu0 %v1293_v15 }
  0xf4   :  { %1518 = vmatprep.mubr.msk.f32.mxu0 %vm1648_vm1, %v1647_v1  ;;  %1544 = vmatpush3.msra.mxu1 %v1311_v16 }
  0xf5   :  { %1519 = vmatmul.mubr.msk.f32.vlgmr.msra.gmra.mxu0 %vm446_vm3, %v596_v19  ;;  %1532 = vmatprep.subr.mxu0 %v1647_v1 }
  0xf6   :  { %1545 = vmatprep.subr.mxu1 %v1647_v1  ;;  %1533 = vmatpush3.msra.mxu0 %v1306_v20 }
  0xf7   :  { %1546 = vmatpush3.msra.mxu1 %v1310_v21  ;;  %1534 = vmatprep.subr.mxu0 %v1647_v1 }
  0xf8   :  { %1547 = vmatprep.subr.mxu1 %v1647_v1  ;;  %1535 = vmatpush3.msra.mxu0 %v1305_v22 }
  0xf9   :  { %1548 = vmatpush3.msra.mxu1 %v1309_v24  ;;  %1536 = vmatprep.subr.mxu0 %v1647_v1 }
  0xfa   :  { %1549 = vmatprep.subr.mxu1 %v1647_v1  ;;  %1537 = vmatpush3.msra.mxu0 %v1304_v25 }
  0xfb   :  { %1550 = vmatpush3.msra.mxu1 %v1308_v26  ;;  %1551 = vmatprep.mubr.msk.f32.mxu1 %vm1648_vm1, %v1647_v1 }
  0xfc   :  { %1538 = vmatprep.subr.mxu0 %v1647_v1  ;;  %1552 = vmatmul.mubr.msk.f32.vlgmr.msra.gmra.mxu1 %vm446_vm3, %v833_v27 }
  0xfd   :  { %1565 = vmatprep.subr.mxu1 %v1647_v1  ;;  %1539 = vmatpush3.msra.mxu0 %v1303_v28 }
  0xfe   :  { %1540 = vmatprep.mubr.msk.f32.mxu0 %vm1648_vm1, %v1647_v1  ;;  %1566 = vmatpush3.msra.mxu1 %v1321_v29 }
  0xff   :  { %1541 = vmatmul.mubr.msk.f32.vlgmr.msra.gmra.mxu0 %vm446_vm3, %v433_v23  ;;  %1554 = vmatprep.subr.mxu0 %v1647_v1 }
 0x100   :  { %1567 = vmatprep.subr.mxu1 %v1647_v1  ;;  %1555 = vmatpush3.msra.mxu0 %v1316_v31  ;;  %v1328_v31 = vld [vmem:[%s2073_s4] ss:$0 sm:$0xff] }
 0x101   :  { %1568 = vmatpush3.msra.mxu1 %v1320_v32  ;;  %1556 = vmatprep.subr.mxu0 %v1647_v1 }
 0x102   :  { %1569 = vmatprep.subr.mxu1 %v1647_v1  ;;  %1557 = vmatpush3.msra.mxu0 %v1315_v33 }
 0x103   :  { %1570 = vmatpush3.msra.mxu1 %v1319_v35  ;;  %1558 = vmatprep.subr.mxu0 %v1647_v1 }
 0x104   :  { %1571 = vmatprep.subr.mxu1 %v1647_v1  ;;  %1559 = vmatpush3.msra.mxu0 %v1314_v36  ;;  %v1329_v36 = vld [vmem:[%s2075_s6] ss:$0 sm:$0xff] }
 0x105   :  { %1572 = vmatpush3.msra.mxu1 %v1318_v41  ;;  %1573 = vmatprep.mubr.msk.f32.mxu1 %vm1648_vm1, %v1647_v1 }
 0x106   :  { %1560 = vmatprep.subr.mxu0 %v1647_v1  ;;  %1574 = vmatmul.mubr.msk.f32.vlgmr.msra.gmra.mxu1 %vm446_vm3, %v991_v43 }
 0x107   :  { %1561 = vmatpush3.msra.mxu0 %v1313_v30  ;;  %1562 = vmatprep.mubr.msk.f32.mxu0 %vm1648_vm1, %v1647_v1 }
 0x108   :  { %1563 = vmatmul.mubr.msk.f32.vlgmr.msra.gmra.mxu0 %vm446_vm3, %v912_v45  ;;  %1576 = vmatprep.subr.mxu0 %v1647_v1 }
 0x109   :  { %1577 = vmatpush3.msra.mxu0 %v1326_v48  ;;  %1584 = vmatprep.mubr.msk.f32.mxu0 %vm1648_vm1, %v1647_v1 }
 0x10a   :  { %1578 = vmatprep.subr.mxu0 %v1647_v1  ;;  %1587 = vmatprep.subr.mxu1 %v1647_v1 }
 0x10b   :  { %1579 = vmatpush3.msra.mxu0 %v1325_v37  ;;  %1619 = vmatprep.mubr.msk.f32.mxu1 %vm1648_vm1, %v1647_v1 }
 0x10c   :  { %1580 = vmatprep.subr.mxu0 %v1647_v1  ;;  %1588 = vmatpush3.msra.mxu1 %v1168_v54 }
 0x10d   :  { %1581 = vmatpush3.msra.mxu0 %v1324_v51  ;;  %1589 = vmatprep.subr.mxu1 %v1647_v1 }
 0x10e   :  { %1582 = vmatprep.subr.mxu0 %v1647_v1  ;;  %1590 = vmatpush3.msra.mxu1 %v1167_v55 }
 0x10f   :  { %1583 = vmatpush3.msra.mxu0 %v1323_v52  ;;  %1591 = vmatprep.subr.mxu1 %v1647_v1 }
 0x110   :  { %1585 = vmatmul.mubr.msk.f32.vlgmr.msra.gmra.mxu0 %vm446_vm3, %v434_v53  ;;  %1592 = vmatpush3.msra.mxu1 %v1166_v56 }
 0x111   :  { %1593 = vmatprep.subr.mxu1 %v1647_v1 }
 0x112   :  { %1594 = vmatpush3.msra.mxu1 %v1165_v57 }
 0x113   :  { %1595 = vmatprep.subr.mxu1 %v1647_v1 }
 0x114   :  { %1596 = vmatpush3.msra.mxu1 %v1164_v58 }
 0x115   :  { %1597 = vmatprep.subr.mxu1 %v1647_v1 }
 0x116   :  { %1598 = vmatpush3.msra.mxu1 %v1163_v59 }
 0x117   :  { %1599 = vmatprep.subr.mxu1 %v1647_v1 }
 0x118   :  { %1600 = vmatpush3.msra.mxu1 %v1162_v60 }
 0x119   :  { %1601 = vmatprep.subr.mxu1 %v1647_v1 }
 0x11a   :  { %1602 = vmatpush3.msra.mxu1 %v1161_v61 }
 0x11b   :  { %1603 = vmatprep.subr.mxu1 %v1647_v1 }
 0x11c   :  { %1604 = vmatpush3.msra.mxu1 %v1160_v62 }
 0x11d   :  { %1605 = vmatprep.subr.mxu1 %v1647_v1 }
 0x11e   :  { %1606 = vmatpush3.msra.mxu1 %v1159_v63 }
 0x11f   :  { %1607 = vmatprep.subr.mxu1 %v1647_v1 }
 0x120   :  { %1608 = vmatpush3.msra.mxu1 %v1158_v0 }
 0x121   :  { %1609 = vmatprep.subr.mxu1 %v1647_v1 }
 0x122   :  { %1610 = vmatpush3.msra.mxu1 %v1157_v2 }
 0x123   :  { %1611 = vmatprep.subr.mxu1 %v1647_v1 }
 0x124   :  { %1612 = vmatpush3.msra.mxu1 %v1156_v3 }
 0x125   :  { %1613 = vmatprep.subr.mxu1 %v1647_v1 }
 0x126   :  { %1614 = vmatpush3.msra.mxu1 %v1155_v4 }
 0x127   :  { %1615 = vmatprep.subr.mxu1 %v1647_v1 }
 0x128   :  { %1616 = vmatpush3.msra.mxu1 %v1154_v5 }
 0x129   :  { %1617 = vmatprep.subr.mxu1 %v1647_v1 }
 0x12a   :  { %1618 = vmatpush3.msra.mxu1 %v1153_v6 }
 0x1aa   :  { %v587_v7 = vpop.f32.mrf.mxu1 }
 0x1ac   :  { %v515_v8 = vpop.f32.mrf.mxu0  ;;  %v1509_v9 = vpop.f32.mrf.mxu1 }
 0x1ad   :  { %v588_v16 = vadd.f32 %v587_v7, %v515_v8 }
 0x1ae   :  { %v1498_v10 = vpop.f32.mrf.mxu0 }
 0x1b2   :  { %v744_v11 = vpop.f32.mrf.mxu1 }
 0x1b4   :  { %v1531_v12 = vpop.f32.mrf.mxu1 }
 0x1b5   :  { %v665_v13 = vpop.f32.mrf.mxu0 }
 0x1b6   :  { %v669_v18 = vadd.f32 %v665_v13, %v588_v16 }
 0x1b7   :  { %v1520_v14 = vpop.f32.mrf.mxu0 }
 0x1b8   :  { %v748_v1 = vadd.f32 %v744_v11, %v669_v18 }
 0x1bc   :  { %v902_v15 = vpop.f32.mrf.mxu1 }
 0x1be   :  { %v1553_v17 = vpop.f32.mrf.mxu1 }
 0x1bf   :  { %v823_v19 = vpop.f32.mrf.mxu0 }
 0x1c0   :  { %v827_v21 = vadd.f32 %v823_v19, %v748_v1 }
 0x1c1   :  { %v1542_v20 = vpop.f32.mrf.mxu0 }
 0x1c2   :  { %v906_v25 = vadd.f32 %v902_v15, %v827_v21 }
 0x1c6   :  { %v1060_v22 = vpop.f32.mrf.mxu1 }
 0x1c8   :  { %v981_v23 = vpop.f32.mrf.mxu0  ;;  %v1575_v24 = vpop.f32.mrf.mxu1 }
 0x1c9   :  { %v985_v27 = vadd.f32 %v981_v23, %v906_v25 }
 0x1ca   :  { %v1564_v26 = vpop.f32.mrf.mxu0 }
 0x1cb   :  { %v1064_v28 = vadd.f32 %v1060_v22, %v985_v27 }
 0x1d0   :  { %v1139_v29 = vpop.f32.mrf.mxu0 }
 0x1d1   :  { %v1143_v32 = vadd.f32 %v1139_v29, %v1064_v28 }
 0x1d2   :  { %v1586_v33 = vpop.f32.mrf.mxu0 }
 0x1d3   :  { %v1151_v34 = vadd.f32 %v1328_v31, %v1143_v32 }
 0x1d5   :  { %v1152_v35 = vmax.f32 %v1151_v34, 0.0 }
 0x1d7   :  { %1620 = vmatmul.mubr.f32.vlgmr.msra.gmra.mxu1 %v1152_v35 }
 0x297   :  { %v1242_v38 = vpop.f32.mrf.mxu1 }
 0x298   :  { %v1243_v39 = vadd.f32 %v1329_v36, %v1242_v38 }
 0x299   :  { %v1621_v41 = vpop.f32.mrf.mxu1 }
 0x29a   :  { %1246 = vst [vmem:[#allocation2] sm:$0x3] %v1243_v39 }
 0x29b   :  { %1636 = shalt.err (!%p1633_p4)
}
 0x29c   :  { %1256 = dma.vmem_to_hbm [thread:$0]  %s1254_s12, 32, %s2076_s7, [#allocation3]  }
 0x29d   :  { %1645 = dma.done.wait [#allocation3], 32  }
 0x29e   :  { %1646 = vsyncadd [#allocation3], 4294967264 }
 0x29f   :  { %1260 = vsyncpa [#allocation3], 1 }

</bundles_post_ra>
